<compile_context>
chip_gen: v5e
topology: v5e:2x2
jax: 0.10.0
libtpu: 0.0.40
codegen_flags: <defaults>
</compile_context>

<pallas_src>
import functools

import jax
import jax.numpy as jnp
from jax.experimental import pallas as pl
from jax.experimental.pallas import tpu as pltpu

LANES = 128
DEFAULT_STEP_BYTES = 6 << 20     # ~6 MiB of preds+labels per grid step
DEFAULT_NUM_SPLITS = 2           # D-range split for v7x megacore


def _cdiv(a, b):
    return -(-a // b)


def _pow_gamma(x, gamma):
    """x**gamma with cheap special cases for small integer gamma."""
    g = float(gamma)
    if g == 0.0:
        return jnp.ones_like(x)
    if g == int(g) and 1 <= int(g) <= 8:
        out = x
        for _ in range(int(g) - 1):
            out = out * x
        return out
    return jnp.power(x, g)


def _focal_kernel(alpha_ref, preds_ref, lab_ref, out_ref, *, gamma, td,
                  d_total, nd, nt, has_partial, has_invalid):
    """One (batch, split, d-tile) grid step.

    preds_ref : (2, td, H, W)   class-0 / class-1 logits (native dtype)
    lab_ref   : (td, H, W)      integer labels in {0, 1}
    out_ref   : (H, W) f32      per-(batch, split) partial sums, resident
                                across the innermost (d-tile) grid axis
    """
    s = pl.program_id(1)
    i = pl.program_id(2)
    blk = s * nt + i                          # d-block handled by this step

    @pl.when(i == 0)
    def _():
        out_ref[...] = jnp.zeros_like(out_ref)

    a0 = alpha_ref[0]
    a1 = alpha_ref[1]

    def accumulate(mask_tail):
        x0 = preds_ref[0].astype(jnp.float32)         # (td, H, W)
        x1 = preds_ref[1].astype(jnp.float32)
        lab_f = lab_ref[...].astype(jnp.float32)      # 0.0 or 1.0

        # 2-class log-softmax in sigmoid/softplus form:
        #   d = x_other - x_selected; 1 - p = sigmoid(d); log p = -softplus(d)
        d = (x1 - x0) * (1.0 - 2.0 * lab_f)           # sign flip instead of select
        e = jnp.exp(-jnp.abs(d))                      # the single EUP exp
        t = 1.0 + e
        r = pl.reciprocal(t, approx=True)             # EUP vrcp (separate slot)
        r = r * (2.0 - t * r)                         # one Newton step -> ~f32 exact
        one_minus_p = jnp.where(d >= 0.0, 1.0, e) * r
        logp = -(jnp.maximum(d, 0.0) + jnp.log(t))    # the single EUP log
        alpha = a0 + (a1 - a0) * lab_f                # lerp instead of select
        loss = -alpha * _pow_gamma(one_minus_p, gamma) * logp

        if mask_tail:
            dd = jax.lax.broadcasted_iota(jnp.int32, loss.shape, 0)
            loss = jnp.where(blk * td + dd < d_total, loss, 0.0)

        # Fold this block into the resident per-(b, s) partial-sum tile.
        # Pure VPU adds; the cross-lane reduce of the tiny partials tensor
        # happens once outside the kernel.
        out_ref[...] += loss.sum(axis=0)

    if not has_partial and not has_invalid:
        accumulate(False)
    elif has_partial:
        # Only the one partial d-block pays for the mask; everything else runs
        # the lean path.  (blk == nd - 1 implies the block is in range; steps
        # with blk >= nd -- possible when the split is ragged -- are skipped.)
        @pl.when(blk < nd - 1)
        def _():
            accumulate(False)

        @pl.when(blk == nd - 1)
        def _():
            accumulate(True)
    else:
        # Full blocks only, but some grid steps of the ragged split map past
        # the last block -> skip them (their DMA reads the clamped last block).
        @pl.when(blk < nd)
        def _():
            accumulate(False)


def focal_loss_pallas(preds, labels, *, alpha=0.25, gamma=2.0, num_classes=2,
                      size_average=True, target_step_bytes=DEFAULT_STEP_BYTES,
                      num_splits=DEFAULT_NUM_SPLITS):
    """preds: [B, 2, D, H, W] float (any width); labels: [B, D, H, W] integer."""
    assert num_classes == 2, "reference module hard-codes a 2-class view"
    B, C, D, H, W = preds.shape
    assert C == 2
    assert labels.shape == (B, D, H, W)

    # Deterministic parameter setup (same as nn.Module.__init__).
    if isinstance(alpha, (list, tuple)):
        assert len(alpha) == num_classes
        alpha_vec = jnp.asarray(alpha, dtype=jnp.float32)
    else:
        assert alpha < 1
        alpha_vec = jnp.array([alpha, 1.0 - alpha], dtype=jnp.float32)

    # --- tile sizing: pick td (D-slices per step) from a byte budget -------
    def padded_slice_bytes(itemsize):
        # One (H, W) slice as stored in VMEM: minor dims padded to the layout
        # tile (sublane tile grows for packed sub-32-bit dtypes).
        sub = 8 * max(1, 4 // itemsize)
        hp = _cdiv(H, sub) * sub
        wp = _cdiv(W, LANES) * LANES
        return hp * wp * itemsize

    per_slice = (2 * padded_slice_bytes(preds.dtype.itemsize)
                 + padded_slice_bytes(labels.dtype.itemsize))
    td = max(1, min(D, int(target_step_bytes) // per_slice))
    nd = _cdiv(D, td)                      # number of D blocks
    nsplit = max(1, min(int(num_splits), nd))
    nt = _cdiv(nd, nsplit)                 # inner (reduction) grid extent

    has_partial = (D % td) != 0            # last block has garbage D rows
    has_invalid = nt * nsplit > nd         # ragged split -> some steps skipped

    def d_block(s, i):
        blk = s * nt + i
        if has_invalid:
            blk = jnp.minimum(blk, nd - 1)   # keep the DMA in bounds
        return blk

    kernel = functools.partial(
        _focal_kernel, gamma=float(gamma), td=td, d_total=D, nd=nd, nt=nt,
        has_partial=has_partial, has_invalid=has_invalid)

    # Double-buffered preds+labels blocks + the resident output tile.
    vmem_bytes = 2 * td * per_slice + padded_slice_bytes(4) + (2 << 20)
    vmem_bytes = int(max(vmem_bytes, 32 << 20))   # raise v5e's 16 MiB default

    partials = pl.pallas_call(
        kernel,
        out_shape=jax.ShapeDtypeStruct((B, nsplit, H, W), jnp.float32),
        grid_spec=pltpu.PrefetchScalarGridSpec(
            num_scalar_prefetch=0,
            grid=(B, nsplit, nt),
            in_specs=[
                pl.BlockSpec(memory_space=pltpu.MemorySpace.SMEM),  # alpha (2,)
                # both class planes of batch b, D-slab blk -- native NCDHW
                pl.BlockSpec((None, 2, td, H, W),
                             lambda b, s, i: (b, 0, d_block(s, i), 0, 0)),
                pl.BlockSpec((None, td, H, W),
                             lambda b, s, i: (b, d_block(s, i), 0, 0)),
            ],
            out_specs=pl.BlockSpec((None, None, H, W),
                                   lambda b, s, i: (b, s, 0, 0)),
        ),
        compiler_params=pltpu.CompilerParams(
            dimension_semantics=("parallel", "parallel", "arbitrary"),
            vmem_limit_bytes=vmem_bytes),
    )(alpha_vec, preds, labels)

    total = jnp.sum(partials)
    n_total = B * D * H * W
    if size_average:
        return total / jnp.float32(n_total)
    return total


def focal_loss_ref(preds, labels, *, alpha=0.25, gamma=2.0, size_average=True):
    """Pure-JAX reference mirroring the PyTorch forward."""
    if isinstance(alpha, (list, tuple)):
        alpha_vec = jnp.asarray(alpha, dtype=jnp.float32)
    else:
        alpha_vec = jnp.array([alpha, 1.0 - alpha], dtype=jnp.float32)
    p = jnp.transpose(preds, (0, 2, 3, 4, 1)).reshape(-1, 2).astype(jnp.float32)
    lab = labels.reshape(-1).astype(jnp.int32)
    logsm = jax.nn.log_softmax(p, axis=1)
    sm = jnp.exp(logsm)
    logp = jnp.take_along_axis(logsm, lab[:, None], axis=1)[:, 0]
    pt = jnp.take_along_axis(sm, lab[:, None], axis=1)[:, 0]
    a = alpha_vec[lab]
    loss = -a * jnp.power(1.0 - pt, gamma) * logp
    return loss.mean() if size_average else loss.sum()


if __name__ == "__main__":
    key = jax.random.PRNGKey(0)

    def run_case(shape, *, alpha, gamma, size_average, key,
                 preds_dtype=jnp.float32,
                 target_step_bytes=DEFAULT_STEP_BYTES,
                 num_splits=DEFAULT_NUM_SPLITS,
                 rtol=1e-4, atol=1e-5):
        B, D, H, W = shape
        k1, k2 = jax.random.split(key)
        preds = jax.random.normal(k1, (B, 2, D, H, W), dtype=jnp.float32)
        preds = preds.astype(preds_dtype)
        labels = jax.random.randint(k2, (B, D, H, W), 0, 2, dtype=jnp.int32)
        out = focal_loss_pallas(preds, labels, alpha=alpha, gamma=gamma,
                                num_classes=2, size_average=size_average,
                                target_step_bytes=target_step_bytes,
                                num_splits=num_splits)
        out = jax.block_until_ready(out)
        ref = focal_loss_ref(preds, labels, alpha=alpha, gamma=gamma,
                             size_average=size_average)
        assert jnp.allclose(out, ref, rtol=rtol, atol=atol), (shape, out, ref)

    keys = jax.random.split(key, 4)

    # One big block per batch, default byte budget, mean reduction.
    run_case((2, 8, 16, 16), alpha=0.25, gamma=2.0, size_average=True,
             key=keys[0])
    # Many D tiles + D-range split across two streams + list alpha +
    # non-integer gamma + sum reduction (tiny budget forces td=1).
    run_case((2, 8, 16, 16), alpha=[0.3, 0.7], gamma=1.5, size_average=False,
             key=keys[1], target_step_bytes=24_576)
    # B == 1 with ragged D/H/W: exercises the gated tail mask and the skipped
    # (out-of-range) steps of the split axis (the v7x small-batch scenario).
    run_case((1, 5, 10, 12), alpha=0.25, gamma=2.0, size_average=True,
             key=keys[2], target_step_bytes=49_152)
    # bf16 logits passed through natively (no wrapper cast), lane-dense W=128.
    run_case((2, 4, 8, 128), alpha=0.25, gamma=2.0, size_average=True,
             key=keys[3], preds_dtype=jnp.bfloat16)

    print("KERNEL_OK")
</pallas_src>

<mosaic_0001>
module attributes {stable_mosaic.version = 11 : i64} {
  func.func @_focal_kernel(%arg0: i32, %arg1: i32, %arg2: i32, %arg3: memref<2xf32, #tpu.memory_space<smem>>, %arg4: memref<1x2x8x16x16xf32, #tpu.memory_space<vmem>>, %arg5: memref<1x8x16x16xi32, #tpu.memory_space<vmem>>, %arg6: memref<1x1x16x16xf32, #tpu.memory_space<vmem>>) attributes {dimension_semantics = [#tpu.dimension_semantics<parallel>, #tpu.dimension_semantics<parallel>, #tpu.dimension_semantics<arbitrary>], iteration_bounds = array<i64: 2, 1, 1>, scalar_prefetch = 0 : i64, scratch_operands = 0 : i64, tpu.core_type = #tpu.core_type<tc>, window_params = [{transform_indices = @transform_0, window_bounds = array<i64: 2>}, {transform_indices = @transform_1, window_bounds = array<i64: 1, 2, 8, 16, 16>}, {transform_indices = @transform_2, window_bounds = array<i64: 1, 8, 16, 16>}, {transform_indices = @transform_3, window_bounds = array<i64: 1, 1, 16, 16>}]} {
    %c0_i32 = arith.constant 0 : i32
    %0 = arith.cmpi eq, %arg2, %c0_i32 : i32
    %1 = arith.extui %0 : i1 to i32
    %c0_i32_0 = arith.constant 0 : i32
    %2 = arith.cmpi ne, %1, %c0_i32_0 : i32
    scf.if %2 {
      %cst_33 = arith.constant 0.000000e+00 : f32
      %57 = vector.broadcast %cst_33 : f32 to vector<16x16xf32>
      %c0_34 = arith.constant 0 : index
      %c0_35 = arith.constant 0 : index
      %c0_36 = arith.constant 0 : index
      %c0_37 = arith.constant 0 : index
      %58 = vector.load %arg6[%c0_34, %c0_35, %c0_36, %c0_37] : memref<1x1x16x16xf32, #tpu.memory_space<vmem>>, vector<1x1x16x16xf32>
      %59 = vector.shape_cast %58 : vector<1x1x16x16xf32> to vector<16x16xf32>
      %60 = vector.shape_cast %57 : vector<16x16xf32> to vector<1x1x16x16xf32>
      tpu.vector_store %arg6[%c0_34, %c0_35, %c0_36, %c0_37], %60 {strides = array<i32>} : memref<1x1x16x16xf32, #tpu.memory_space<vmem>>, vector<1x1x16x16xf32>,
    } else {
    }
    %c0 = arith.constant 0 : index
    %3 = memref.load %arg3[%c0] : memref<2xf32, #tpu.memory_space<smem>>
    %c1 = arith.constant 1 : index
    %4 = memref.load %arg3[%c1] : memref<2xf32, #tpu.memory_space<smem>>
    %c0_1 = arith.constant 0 : index
    %c0_2 = arith.constant 0 : index
    %c0_3 = arith.constant 0 : index
    %c0_4 = arith.constant 0 : index
    %c0_5 = arith.constant 0 : index
    %5 = vector.load %arg4[%c0_1, %c0_2, %c0_3, %c0_4, %c0_5] : memref<1x2x8x16x16xf32, #tpu.memory_space<vmem>>, vector<1x1x8x16x16xf32>
    %6 = vector.shape_cast %5 : vector<1x1x8x16x16xf32> to vector<8x16x16xf32>
    %c0_6 = arith.constant 0 : index
    %c1_7 = arith.constant 1 : index
    %c0_8 = arith.constant 0 : index
    %c0_9 = arith.constant 0 : index
    %c0_10 = arith.constant 0 : index
    %7 = vector.load %arg4[%c0_6, %c1_7, %c0_8, %c0_9, %c0_10] : memref<1x2x8x16x16xf32, #tpu.memory_space<vmem>>, vector<1x1x8x16x16xf32>
    %8 = vector.shape_cast %7 : vector<1x1x8x16x16xf32> to vector<8x16x16xf32>
    %c0_11 = arith.constant 0 : index
    %c0_12 = arith.constant 0 : index
    %c0_13 = arith.constant 0 : index
    %c0_14 = arith.constant 0 : index
    %9 = vector.load %arg5[%c0_11, %c0_12, %c0_13, %c0_14] : memref<1x8x16x16xi32, #tpu.memory_space<vmem>>, vector<1x8x16x16xi32>
    %10 = vector.shape_cast %9 : vector<1x8x16x16xi32> to vector<8x16x16xi32>
    %11 = arith.sitofp %10 : vector<8x16x16xi32> to vector<8x16x16xf32>
    %12 = arith.subf %8, %6 : vector<8x16x16xf32>
    %cst = arith.constant 2.000000e+00 : f32
    %13 = vector.broadcast %cst : f32 to vector<8x16x16xf32>
    %14 = arith.mulf %13, %11 : vector<8x16x16xf32>
    %cst_15 = arith.constant 1.000000e+00 : f32
    %15 = vector.broadcast %cst_15 : f32 to vector<8x16x16xf32>
    %16 = arith.subf %15, %14 : vector<8x16x16xf32>
    %17 = arith.mulf %12, %16 : vector<8x16x16xf32>
    %18 = math.absf %17 : vector<8x16x16xf32>
    %cst_16 = arith.constant 0.000000e+00 : f32
    %19 = vector.broadcast %cst_16 : f32 to vector<8x16x16xf32>
    %20 = arith.subf %19, %18 : vector<8x16x16xf32>
    %21 = math.exp %20 : vector<8x16x16xf32>
    %cst_17 = arith.constant 1.000000e+00 : f32
    %22 = vector.broadcast %cst_17 : f32 to vector<8x16x16xf32>
    %23 = arith.addf %22, %21 : vector<8x16x16xf32>
    %24 = tpu.reciprocal %23 {approx = true} : vector<8x16x16xf32> -> vector<8x16x16xf32>
    %25 = arith.mulf %23, %24 : vector<8x16x16xf32>
    %cst_18 = arith.constant 2.000000e+00 : f32
    %26 = vector.broadcast %cst_18 : f32 to vector<8x16x16xf32>
    %27 = arith.subf %26, %25 : vector<8x16x16xf32>
    %28 = arith.mulf %24, %27 : vector<8x16x16xf32>
    %cst_19 = arith.constant 0.000000e+00 : f32
    %29 = vector.broadcast %cst_19 : f32 to vector<8x16x16xf32>
    %30 = arith.cmpf oge, %17, %29 : vector<8x16x16xf32>
    %cst_20 = arith.constant 1.000000e+00 : f32
    %31 = vector.broadcast %cst_20 : f32 to vector<8x16x16xf32>
    %32 = arith.select %30, %31, %21 : vector<8x16x16xi1>, vector<8x16x16xf32>
    %33 = arith.mulf %32, %28 : vector<8x16x16xf32>
    %cst_21 = arith.constant 0.000000e+00 : f32
    %34 = vector.broadcast %cst_21 : f32 to vector<8x16x16xf32>
    %35 = arith.maximumf %17, %34 : vector<8x16x16xf32>
    %36 = math.log %23 : vector<8x16x16xf32>
    %37 = arith.addf %35, %36 : vector<8x16x16xf32>
    %cst_22 = arith.constant 0.000000e+00 : f32
    %38 = vector.broadcast %cst_22 : f32 to vector<8x16x16xf32>
    %39 = arith.subf %38, %37 : vector<8x16x16xf32>
    %40 = arith.subf %4, %3 : f32
    %41 = vector.broadcast %40 : f32 to vector<8x16x16xf32>
    %42 = arith.mulf %41, %11 : vector<8x16x16xf32>
    %43 = vector.broadcast %3 : f32 to vector<8x16x16xf32>
    %44 = arith.addf %43, %42 : vector<8x16x16xf32>
    %cst_23 = arith.constant 0.000000e+00 : f32
    %45 = vector.broadcast %cst_23 : f32 to vector<8x16x16xf32>
    %46 = arith.subf %45, %44 : vector<8x16x16xf32>
    %47 = arith.mulf %33, %33 : vector<8x16x16xf32>
    %48 = arith.mulf %46, %47 : vector<8x16x16xf32>
    %49 = arith.mulf %48, %39 : vector<8x16x16xf32>
    %c0_24 = arith.constant 0 : index
    %c0_25 = arith.constant 0 : index
    %c0_26 = arith.constant 0 : index
    %c0_27 = arith.constant 0 : index
    %50 = vector.load %arg6[%c0_24, %c0_25, %c0_26, %c0_27] : memref<1x1x16x16xf32, #tpu.memory_space<vmem>>, vector<1x1x16x16xf32>
    %51 = vector.shape_cast %50 : vector<1x1x16x16xf32> to vector<16x16xf32>
    %cst_28 = arith.constant dense<0.000000e+00> : vector<16x16xf32>
    %52 = vector.multi_reduction <add>, %49, %cst_28 [0] : vector<8x16x16xf32> to vector<16x16xf32>
    %53 = arith.addf %51, %52 : vector<16x16xf32>
    %c0_29 = arith.constant 0 : index
    %c0_30 = arith.constant 0 : index
    %c0_31 = arith.constant 0 : index
    %c0_32 = arith.constant 0 : index
    %54 = vector.load %arg6[%c0_29, %c0_30, %c0_31, %c0_32] : memref<1x1x16x16xf32, #tpu.memory_space<vmem>>, vector<1x1x16x16xf32>
    %55 = vector.shape_cast %54 : vector<1x1x16x16xf32> to vector<16x16xf32>
    %56 = vector.shape_cast %53 : vector<16x16xf32> to vector<1x1x16x16xf32>
    tpu.vector_store %arg6[%c0_29, %c0_30, %c0_31, %c0_32], %56 {strides = array<i32>} : memref<1x1x16x16xf32, #tpu.memory_space<vmem>>, vector<1x1x16x16xf32>,
    return
  }
  func.func @transform_0(%arg0: i32, %arg1: i32, %arg2: i32) -> i32 {
    %c0_i32 = arith.constant 0 : i32
    %c0_i32_0 = arith.constant 0 : i32
    return %c0_i32 : i32
  }
  func.func @transform_1(%arg0: i32, %arg1: i32, %arg2: i32) -> (i32, i32, i32, i32, i32) {
    %c1_i32 = arith.constant 1 : i32
    %0 = arith.muli %arg1, %c1_i32 : i32
    %1 = arith.addi %0, %arg2 : i32
    %c0_i32 = arith.constant 0 : i32
    %c0_i32_0 = arith.constant 0 : i32
    %c0_i32_1 = arith.constant 0 : i32
    %c0_i32_2 = arith.constant 0 : i32
    return %arg0, %c0_i32, %1, %c0_i32_0, %c0_i32_1 : i32, i32, i32, i32, i32
  }
  func.func @transform_2(%arg0: i32, %arg1: i32, %arg2: i32) -> (i32, i32, i32, i32) {
    %c1_i32 = arith.constant 1 : i32
    %0 = arith.muli %arg1, %c1_i32 : i32
    %1 = arith.addi %0, %arg2 : i32
    %c0_i32 = arith.constant 0 : i32
    %c0_i32_0 = arith.constant 0 : i32
    %c0_i32_1 = arith.constant 0 : i32
    return %arg0, %1, %c0_i32, %c0_i32_0 : i32, i32, i32, i32
  }
  func.func @transform_3(%arg0: i32, %arg1: i32, %arg2: i32) -> (i32, i32, i32, i32) {
    %c0_i32 = arith.constant 0 : i32
    %c0_i32_0 = arith.constant 0 : i32
    %c0_i32_1 = arith.constant 0 : i32
    return %arg0, %arg1, %c0_i32, %c0_i32_0 : i32, i32, i32, i32
  }
}

</mosaic_0001>

<bundles_post_ra>
// kernel: tpu_custom_call.1
= control target key start
LH: loop header
LB: loop body
LE: loop exit
PB: predicated region body
PF: predicated region fallthrough
CT: control target
= control target key end

     0   :  { %s2413_s0 = inlined_call_operand.hbm [shape: f32[2], index: 0, kind: input, shape index: {}]   ;;  %s2414_s1 = inlined_call_operand.hbm [shape: f32[2,2,8,16,16], index: 1, kind: input, shape index: {}]   ;;  %s2415_s2 = inlined_call_operand.hbm [shape: s32[2,8,16,16], index: 2, kind: input, shape index: {}]   ;;  %s2416_s3 = inlined_call_operand.hbm [shape: f32[2,1,16,16], index: 3, kind: output, shape index: {}]  }
   0x1   :  { %2468 = sst [smem:[#allocation58_spill]] %s2413_s0 }
   0x2   :  { %8 = vsyncpa [#allocation5], 0 }
   0x3   :  { %9 = vsyncpa [#allocation3], 0 }
   0x4   :  { %11 = vsyncpa [#allocation3 + $0x1], 0 }
   0x5   :  { %12 = vsyncpa [#allocation8], 0 }
   0x6   :  { %14 = vsyncpa [#allocation8 + $0x1], 0 }
   0x7   :  { %15 = vsyncpa [#allocation4], 0 }
   0x8   :  { %17 = vsyncpa [#allocation4 + $0x1], 0  ;;  %s1395_s12 = smov 0   ;;  %s1397_s13 = smov 0  }
   0x9   :  { %s1399_s14 = smov 0   ;;  %s1401_s15 = smov 0  }
   0xa   :  { %s1403_s16 = smov 0   ;;  %s1405_s17 = smov 0  }
   0xb LB: > { %2469 = sst [smem:[#allocation14_spill]] %s1367_s17  ;;  %s982_s18 = sadd.s32 4294967295, %s1367_s17   ;;  %s1367_s17 = sphi %s1405_s17, %s23_s17   ;;  %s1363_s16 = sphi %s1403_s16, %s2638_s16   ;;  %s1359_s15 = sphi %s1401_s15, %s2637_s15   ;;  %s1355_s14 = sphi %s1399_s14, %s2636_s14   ;;  %s1351_s13 = sphi %s1397_s13, %s2635_s13   ;;  %s1347_s12 = sphi %s1395_s12, %s2634_s12  }
   0xc   : > { %s983_s19 = sadd.s32 4294967294, %s1367_s17   ;;  %s74_s20 = sadd.s32 1, %s1355_s14 }
   0xd   : > { %p81_p0 = scmp.ne.s32.totalorder %s1355_s14, %s1351_s13  ;;  %p82_p1 = scmp.eq.s32.totalorder %s1367_s17, 0 }
   0xe   : > { %p87_p2 = scmp.ne.s32.totalorder %s1351_s13, %s1347_s12  ;;  %p1433_p3 = scmp.eq.s32.totalorder %s982_s18, 0 }
   0xf   : > { %p143_p4 = scmp.eq.s32.totalorder %s982_s18, 1  ;;  %p1437_p5 = por %p82_p1, %p81_p0 }
  0x10   : > { %p149_p6 = scmp.eq.s32.totalorder %s983_s19, 1  ;;  %p1443_p7 = por %p1433_p3, %p87_p2 }
  0x11   : > { %p1447_p8 = por %p143_p4, %p81_p0  ;;  %p984_p10 = scmp.ge.s32.totalorder %s1367_s17, 1 }
  0x12   : > { %p1451_p9 = por %p149_p6, %p87_p2  ;;  %p156_p11 = scmp.lt.s32.totalorder %s1367_s17, 3 }
  0x13   : > { %s2475_s0 = sld [smem:[#allocation58_spill]]  ;;  %p986_p13 = scmp.ge.s32.totalorder %s1367_s17, 2 }
  0x14   : > { %p1460_p12 = pnand %p984_p10, %p156_p11  ;;  %p1049_p0 = scmp.lt.s32.totalorder %s1367_s17, 2 }
  0x15   : > { %s42_s4 = sadd.s32 1, %s1363_s16  ;;  %s1478_s5 = sand.u32 1, %s1355_s14  }
  0x16   : > { %p1033_p1 = pneg %p1460_p12  ;;  %p1470_p2 = pnand %p1049_p0, %p1437_p5 }
  0x17   : > { %p44_p6 = scmp.ge.s32.totalorder %s42_s4, 2  ;;  %s1369_s6 = smov [#allocation2]  }
  0x18   : > { %p1034_p4 = pnand %p1033_p1, %p1433_p3  ;;  %s987_s7 = sshll.u32 %s1478_s5, 8 }
  0x19   : > { %s168_s28 = sshll.u32 %s2475_s0, 4  ;;  %s2640_s4 = smov (%p44_p6, %s42_s4), 0  ;;  %s169_s28 = int_to_ptr.hbm [resolvable:$true] %s168_s28 }
  0x1a   : > { %1036 = dma.hbm_to_smem (!%p1034_p4), %s169_s28, 16, %s1369_s6, [#allocation5]  }
  0x1b   : > { %2478 = sst [smem:[#allocation15_spill]] %s2640_s4  ;;  %s69_s8 = ssub.s32 %s1363_s16, %s2640_s4 }
  0x1c   : > { %p72_p5 = scmp.eq.s32.totalorder %s69_s8, 0  ;;  %s1020_s9 = sshll.u32 %s1363_s16, 8 }
  0x1d   : > { %s192_s18 = scalar_lea.hbm %s2414_s1, %s1020_s9  ;;  %s183_s19 = scalar_lea.vmem [#allocation6], %s987_s7 }
  0x1e   : > { %s195_s22 = sshll.u32 %s183_s19, 4  ;;  %s193_s27 = sshll.u32 %s192_s18, 4  ;;  %s196_s22 = int_to_ptr.vmem [resolvable:$true] %s195_s22  ;;  %s194_s27 = int_to_ptr.hbm [resolvable:$true] %s193_s27 }
  0x1f   : > { %s1492_s26 = scalar_select %p72_p5, %s1355_s14, %s74_s20  }
  0x20   : > { %s180_s28 = scalar_lea.sflag [#allocation3], %s1478_s5  ;;  %s1370_s6 = smov 128  }
  0x21   : > { %s1371_s0 = smov 8   ;;  %s990_s8 = sshll.u32 %s1478_s5, 7 }
  0x22   : > { %1040 = dma.hbm_to_vmem [thread:$0]  (!%p1470_p2), %s194_s27, 4096, %s196_s22, %s180_s28, %s1370_s6, %s1370_s6, %s1371_s0  }
  0x23   : > { %s1021_s4 = sshll.u32 %s1363_s16, 7  ;;  %s209_s11 = scalar_lea.vmem [#allocation7], %s990_s8 }
  0x24   : > { %s218_s7 = scalar_lea.hbm %s2415_s2, %s1021_s4  ;;  %s221_s20 = sshll.u32 %s209_s11, 4  ;;  %s222_s20 = int_to_ptr.vmem [resolvable:$true] %s221_s20 }
  0x25   : > { %s219_s9 = sshll.u32 %s218_s7, 4  ;;  %s206_s18 = scalar_lea.sflag [#allocation8], %s1478_s5  ;;  %s220_s9 = int_to_ptr.hbm [resolvable:$true] %s219_s9 }
  0x26   : > { %1043 = dma.hbm_to_vmem [thread:$0]  (!%p1470_p2), %s220_s9, 2048, %s222_s20, %s206_s18, %s1370_s6, %s1370_s6, %s1371_s0  }
  0x27   : > { %233 = sbr.rel (%p1460_p12) target bundleno = 204 (0xcc), region = 32 }
  0x2c   : > { %1330 = dma.done.wait (%p1433_p3), [#allocation5], 16  }
  0x2d   : > { %1332 = vsyncadd (%p1433_p3), [#allocation5], 4294967280  ;;  %s1512_s17 = sand.u32 1, %s1351_s13  }
  0x2e   : > { %s995_s4 = sshll.u32 %s1512_s17, 8  ;;  %s241_s19 = scalar_lea.sflag [#allocation3], %s1512_s17 }
  0x2f   : > { %s1516_s5 = scalar_lea.vmem [#allocation6], %s995_s4 }
  0x30   : > { %1334 = dma.done.wait (%p1443_p7), %s241_s19, 4096  }
  0x31   : > { %1336 = vsyncadd (%p1443_p7), %s241_s19, 4294963200  ;;  %s996_s0 = sshll.u32 %s1512_s17, 7  ;;  %s251_s21 = scalar_lea.sflag [#allocation8], %s1512_s17 }
  0x32   : > { %s1524_s29 = scalar_lea.vmem [#allocation7], %s996_s0 }
  0x33   : > { %1338 = dma.done.wait (%p1443_p7), %s251_s21, 2048  }
  0x34   : > { %1340 = vsyncadd (%p1443_p7), %s251_s21, 4294965248 }
  0x35   : > { %260 = sfence }
  0x36   : > { %s997_s30 = sshll.u32 %s1512_s17, 4  ;;  %vm292_vm0 = vcmask 130048   ;;  %v1372_v0 = vmov 0.0   ;;  %v1538_v1 = vld [vmem:[%s1516_s5] sm:$0xff]  ;;  %v1541_v2 = vld [vmem:[%s1516_s5 + $0x8] sm:$0xff]  ;;  %v1544_v3 = vld [vmem:[%s1516_s5 + $0x10] sm:$0xff] }
  0x37   : > { %s1531_s22 = scalar_lea.vmem [#allocation9], %s997_s30  ;;  %v1547_v4 = vld [vmem:[%s1516_s5 + $0x80] sm:$0xff]  ;;  %v1550_v5 = vld [vmem:[%s1516_s5 + $0x88] sm:$0xff]  ;;  %v1553_v6 = vld [vmem:[%s1516_s5 + $0x18] sm:$0xff]  ;;  %s1937_s23 = sld [smem:[#allocation2]] }
  0x38   : > { %293 = vst.msk [vmem:[%s1531_s22] sm:$0xff] %vm292_vm0, %v1372_v0  ;;  %v1556_v7 = vld [vmem:[%s1516_s5 + $0x20] sm:$0xff]  ;;  %v1559_v8 = vld [vmem:[%s1516_s5 + $0x28] sm:$0xff]  ;;  %v1562_v9 = vld [vmem:[%s1516_s5 + $0x30] sm:$0xff]  ;;  %s1947_s27 = sld [smem:[#allocation2 + $0x1]]  ;;  %s1022_s6 = sshll.u32 %s1359_s15, 4 }
  0x39   : > { %294 = vst.msk [vmem:[%s1531_s22 + $0x8] sm:$0xff] %vm292_vm0, %v1372_v0  ;;  %v1565_v10 = vld [vmem:[%s1516_s5 + $0x90] sm:$0xff]  ;;  %v1568_v11 = vld [vmem:[%s1516_s5 + $0x98] sm:$0xff]  ;;  %v1571_v12 = vld [vmem:[%s1516_s5 + $0xa0] sm:$0xff]  ;;  %s848_s7 = scalar_lea.hbm %s2416_s3, %s1022_s6  ;;  %s849_s15 = sshll.u32 %s1531_s22, 4  ;;  %s850_s15 = int_to_ptr.vmem [resolvable:$true] %s849_s15 }
  0x3a   : > { %v1574_v13 = vld [vmem:[%s1516_s5 + $0x38] sm:$0xff]  ;;  %v1577_v14 = vld [vmem:[%s1516_s5 + $0xa8] sm:$0xff]  ;;  %v1580_v15 = vld [vmem:[%s1516_s5 + $0xb0] sm:$0xff]  ;;  %s851_s9 = sshll.u32 %s848_s7, 4  ;;  %s835_s11 = scalar_lea.sflag [#allocation4], %s1512_s17  ;;  %s852_s9 = int_to_ptr.hbm [resolvable:$true] %s851_s9 }
  0x3b   : > { %v1583_v16 = vld [vmem:[%s1516_s5 + $0xb8] sm:$0xff]  ;;  %v1586_v17 = vld [vmem:[%s1516_s5 + $0x40] sm:$0xff]  ;;  %v1589_v18 = vld [vmem:[%s1516_s5 + $0x48] sm:$0xff]  ;;  %s1291_s20 = sshra.s32 %s852_s9, 4  ;;  %s1292_s20 = int_to_ptr.hbm [resolvable:$true] %s1291_s20 }
  0x3c   : > { %v1592_v19 = vld [vmem:[%s1516_s5 + $0x50] sm:$0xff]  ;;  %v1595_v20 = vld [vmem:[%s1516_s5 + $0xc0] sm:$0xff]  ;;  %v1598_v21 = vld [vmem:[%s1516_s5 + $0xc8] sm:$0xff]  ;;  %s1293_s18 = scalar_lea.hbm %s1292_s20, 16  ;;  %p1298_p11 = scmp.lt.s32.totalorder %s1292_s20, %s2416_s3 }
  0x3d   : > { %v1601_v22 = vld [vmem:[%s1516_s5 + $0xd0] sm:$0xff]  ;;  %v1604_v23 = vld [vmem:[%s1516_s5 + $0x58] sm:$0xff]  ;;  %v1607_v24 = vld [vmem:[%s1516_s5 + $0x60] sm:$0xff]  ;;  %p1294_p3 = scmp.ne.s32.totalorder %s1292_s20, %s1293_s18 }
  0x3e   : > { %v1610_v25 = vld [vmem:[%s1516_s5 + $0x68] sm:$0xff]  ;;  %v1613_v26 = vld [vmem:[%s1516_s5 + $0xd8] sm:$0xff]  ;;  %v1616_v27 = vld [vmem:[%s1524_s29] sm:$0xff]  ;;  %s698_s28 = ssub.f32 %s1947_s27, %s1937_s23 }
  0x3f   : > { %2479 = vst [vmem:[#allocation16_spill] sm:$0xff] %v1616_v27  ;;  %v1619_v28 = vld [vmem:[%s1524_s29 + $0x8] sm:$0xff]  ;;  %v1622_v29 = vld [vmem:[%s1516_s5 + $0x70] sm:$0xff]  ;;  %v1625_v30 = vld [vmem:[%s1516_s5 + $0xe0] sm:$0xff]  ;;  %v2420_v46 = vcvt.s32.f32 %v1616_v27  ;;  %p1295_p7 = pnand %p1294_p3, %p1447_p8 }
  0x40   : > { %2480 = vst [vmem:[#allocation17_spill] sm:$0xff] %v1619_v28  ;;  %v1628_v31 = vld [vmem:[%s1524_s29 + $0x10] sm:$0xff]  ;;  %v1631_v32 = vld [vmem:[%s1524_s29 + $0x18] sm:$0xff]  ;;  %v1640_v36 = vld [vmem:[%s1516_s5 + $0xe8] sm:$0xff]  ;;  %v2421_v47 = vcvt.s32.f32 %v1619_v28 }
  0x41   : > { %2481 = vst [vmem:[#allocation18_spill] sm:$0xff] %v1628_v31  ;;  %v1643_v37 = vld [vmem:[%s1516_s5 + $0xf0] sm:$0xff]  ;;  %v1646_v38 = vld [vmem:[%s1524_s29 + $0x20] sm:$0xff]  ;;  %v1657_v43 = vld [vmem:[%s1524_s29 + $0x28] sm:$0xff]  ;;  %v2422_v48 = vcvt.s32.f32 %v1628_v31  ;;  %v2423_v52 = vcvt.s32.f32 %v1631_v32  ;;  %v378_v42 = vmul.f32 2.0, %v2420_v46  ;;  %p1296_p10 = pneg %p1295_p7 }
  0x42   : > { %2482 = vst [vmem:[#allocation19_spill] sm:$0xff] %v1631_v32  ;;  %v1660_v44 = vld [vmem:[%s1524_s29 + $0x30] sm:$0xff]  ;;  %v1663_v45 = vld [vmem:[%s1524_s29 + $0x38] sm:$0xff]  ;;  %v1674_v51 = vld [vmem:[%s1524_s29 + $0x40] sm:$0xff]  ;;  %v2427_v59 = vcvt.s32.f32 %v1646_v38  ;;  %v2429_v54 = vcvt.s32.f32 %v1657_v43  ;;  %v379_v41 = vmul.f32 2.0, %v2421_v47 }
  0x43   : > { %2483 = vst [vmem:[#allocation20_spill] sm:$0xff] %v1646_v38  ;;  %v1671_v50 = vld [vmem:[%s1516_s5 + $0x78] sm:$0xff]  ;;  %v1687_v57 = vld [vmem:[%s1524_s29 + $0x48] sm:$0xff]  ;;  %v1690_v58 = vld [vmem:[%s1524_s29 + $0x50] sm:$0xff]  ;;  %v2431_v53 = vcvt.s32.f32 %v1660_v44  ;;  %v2433_v49 = vcvt.s32.f32 %v1663_v45  ;;  %v380_v40 = vmul.f32 2.0, %v2422_v48  ;;  %v381_v34 = vmul.f32 2.0, %v2423_v52 }
  0x44   : > { %2484 = vst [vmem:[#allocation21_spill] sm:$0xff] %v1657_v43  ;;  %v1684_v56 = vld [vmem:[%s1516_s5 + $0xf8] sm:$0xff]  ;;  %v1703_v0 = vld [vmem:[%s1524_s29 + $0x60] sm:$0xff]  ;;  %v1706_v55 = vld [vmem:[%s1524_s29 + $0x68] sm:$0xff]  ;;  %v382_v48 = vmul.f32 2.0, %v2427_v59  ;;  %v383_v35 = vmul.f32 2.0, %v2429_v54  ;;  %v2495_v46 = vcvt.s32.f32 %v1674_v51  ;;  %v2496_v59 = vcvt.s32.f32 %v1687_v57 }
  0x45   : > { %2485 = vst [vmem:[#allocation22_spill] sm:$0xff] %v1660_v44  ;;  %v1700_v63 = vld [vmem:[%s1524_s29 + $0x58] sm:$0xff]  ;;  %v1714_v61 = vld [vmem:[%s1524_s29 + $0x70] sm:$0xff]  ;;  %v384_v60 = vmul.f32 2.0, %v2431_v53  ;;  %v385_v52 = vmul.f32 2.0, %v2433_v49  ;;  %v394_v62 = vsub.f32 1.0, %v378_v42  ;;  %v2497_v43 = vcvt.s32.f32 %v1690_v58 }
  0x46   : > { %2486 = vst [vmem:[#allocation23_spill] sm:$0xff] %v1663_v45  ;;  %v1730_v33 = vld [vmem:[%s1524_s29 + $0x78] sm:$0xff]  ;;  %v386_v32 = vmul.f32 2.0, %v2495_v46  ;;  %v395_v31 = vsub.f32 1.0, %v379_v41  ;;  %v396_v47 = vsub.f32 1.0, %v380_v40  ;;  %v387_v39 = vmul.f32 2.0, %v2496_v59 }
  0x47   : > { %2487 = vst [vmem:[#allocation24_spill] sm:$0xff] %v1674_v51  ;;  %v388_v54 = vmul.f32 2.0, %v2497_v43  ;;  %v397_v28 = vsub.f32 1.0, %v381_v34  ;;  %v2498_v53 = vcvt.s32.f32 %v1700_v63  ;;  %v2499_v49 = vcvt.s32.f32 %v1703_v0  ;;  %s1297_s5 = scalar_lea.hbm %s2416_s3, 32 }
  0x48   : > { %2488 = vst [vmem:[#allocation25_spill] sm:$0xff] %v1687_v57  ;;  %v2500_v46 = vcvt.s32.f32 %v1706_v55  ;;  %v398_v41 = vsub.f32 1.0, %v382_v48  ;;  %v2501_v40 = vcvt.s32.f32 %v1714_v61  ;;  %v399_v51 = vsub.f32 1.0, %v383_v35  ;;  %p1299_p12 = scmp.lt.s32.totalorder %s1297_s5, %s1293_s18 }
  0x49   : > { %2489 = vst [vmem:[#allocation26_spill] sm:$0xff] %v1690_v58  ;;  %v389_v44 = vmul.f32 2.0, %v2498_v53  ;;  %v390_v45 = vmul.f32 2.0, %v2499_v49  ;;  %v400_v57 = vsub.f32 1.0, %v384_v60  ;;  %v401_v59 = vsub.f32 1.0, %v385_v52 }
  0x4a   : > { %2490 = vst [vmem:[#allocation27_spill] sm:$0xff] %v1700_v63  ;;  %v391_v42 = vmul.f32 2.0, %v2500_v46  ;;  %v392_v38 = vmul.f32 2.0, %v2501_v40  ;;  %v402_v27 = vsub.f32 1.0, %v386_v32  ;;  %v2502_v34 = vsub.f32 %v1547_v4, %v1538_v1  ;;  %p1300_p0 = por %p1299_p12, %p1298_p11 }
  0x4b   : > { %2491 = vst [vmem:[#allocation28_spill] sm:$0xff] %v1703_v0  ;;  %v2504_v53 = vsub.f32 %v1550_v5, %v1541_v2  ;;  %v2506_v48 = vsub.f32 %v1565_v10, %v1544_v3  ;;  %v2508_v35 = vcvt.s32.f32 %v1730_v33  ;;  %v403_v52 = vsub.f32 1.0, %v387_v39 }
  0x4c   : > { %2492 = vst [vmem:[#allocation29_spill] sm:$0xff] %v1706_v55  ;;  %v1762_v43 = vmul.f32 %v394_v62, %v2502_v34  ;;  %v404_v32 = vsub.f32 1.0, %v388_v54  ;;  %v2509_v1 = vsub.f32 %v1568_v11, %v1553_v6  ;;  %v405_v62 = vsub.f32 1.0, %v389_v44  ;;  %p1301_p1 = pnand %p1300_p0, %p1296_p10 }
  0x4d   : > { %2493 = vst [vmem:[#allocation30_spill] sm:$0xff] %v1714_v61  ;;  %v1767_v49 = vmul.f32 %v395_v31, %v2504_v53  ;;  %v1772_v46 = vmul.f32 %v396_v47, %v2506_v48  ;;  %v393_v60 = vmul.f32 2.0, %v2508_v35  ;;  %v406_v40 = vsub.f32 1.0, %v390_v45 }
  0x4e   : > { %2494 = vst [vmem:[#allocation31_spill] sm:$0xff] %v1730_v33  ;;  %v1779_v4 = vmul.f32 %v397_v28, %v2509_v1  ;;  %v407_v2 = vsub.f32 1.0, %v391_v42  ;;  %v2511_v5 = vsub.f32 %v1571_v12, %v1556_v7  ;;  %v408_v3 = vsub.f32 1.0, %v392_v38 }
  0x4f   : > { %2503 = vst [vmem:[#allocation32_spill] sm:$0xff] %v1762_v43  ;;  %v2513_v10 = vsub.f32 %v1577_v14, %v1559_v8  ;;  %v2515_v39 = vsub.f32 %v1580_v15, %v1562_v9  ;;  %v2517_v11 = vsub.f32 %v1583_v16, %v1574_v13  ;;  %v2519_v7 = vsub.f32 %v1595_v20, %v1586_v17 }
  0x50   : > { %2505 = vst [vmem:[#allocation33_spill] sm:$0xff] %v1767_v49  ;;  %v1784_v31 = vmul.f32 %v398_v41, %v2511_v5  ;;  %v426_v38 = vand.u32 2147483647, %v1762_v43  ;;  %v427_v8 = vand.u32 2147483647, %v1767_v49  ;;  %v409_v44 = vsub.f32 1.0, %v393_v60 }
  0x51   : > { %2507 = vst [vmem:[#allocation34_spill] sm:$0xff] %v1772_v46  ;;  %v1789_v47 = vmul.f32 %v399_v51, %v2513_v10  ;;  %v1794_v6 = vmul.f32 %v400_v57, %v2515_v39  ;;  %v1799_v28 = vmul.f32 %v401_v59, %v2517_v11  ;;  %v1804_v12 = vmul.f32 %v402_v27, %v2519_v7 }
  0x52   : > { %2510 = vst [vmem:[#allocation35_spill] sm:$0xff] %v1779_v4  ;;  %v428_v14 = vand.u32 2147483647, %v1772_v46  ;;  %v2521_v9 = vsub.f32 %v1598_v21, %v1589_v18  ;;  %v2523_v13 = vsub.f32 %v1601_v22, %v1592_v19  ;;  %v429_v17 = vand.u32 2147483647, %v1779_v4 }
  0x53   : > { %2512 = vst [vmem:[#allocation36_spill] sm:$0xff] %v1784_v31  ;;  %v2525_v20 = vsub.f32 %v1613_v26, %v1604_v23  ;;  %v2527_v45 = vsub.f32 %v1625_v30, %v1607_v24  ;;  %v2529_v18 = vsub.f32 %v1640_v36, %v1610_v25  ;;  %v430_v19 = vand.u32 2147483647, %v1784_v31 }
  0x54   : > { %2514 = vst [vmem:[#allocation37_spill] sm:$0xff] %v1789_v47  ;;  %v1812_v15 = vmul.f32 %v403_v52, %v2521_v9  ;;  %v1817_v16 = vmul.f32 %v404_v32, %v2523_v13  ;;  %v2531_v22 = vsub.f32 %v1643_v37, %v1622_v29  ;;  %v431_v23 = vand.u32 2147483647, %v1789_v47 }
  0x55   : > { %2516 = vst [vmem:[#allocation38_spill] sm:$0xff] %v1794_v6  ;;  %v1823_v27 = vmul.f32 %v405_v62, %v2525_v20  ;;  %v1828_v51 = vmul.f32 %v406_v40, %v2527_v45  ;;  %v1833_v21 = vmul.f32 %v407_v2, %v2529_v18  ;;  %v432_v26 = vand.u32 2147483647, %v1794_v6 }
  0x56   : > { %2518 = vst [vmem:[#allocation39_spill] sm:$0xff] %v1799_v28  ;;  %v1839_v54 = vmul.f32 %v408_v3, %v2531_v22  ;;  %v433_v24 = vand.u32 2147483647, %v1799_v28  ;;  %v434_v30 = vand.u32 2147483647, %v1804_v12  ;;  %v442_v57 = vsub.f32 0.0, %v426_v38 }
  0x57   : > { %2520 = vst [vmem:[#allocation40_spill] sm:$0xff] %v1804_v12  ;;  %v443_v42 = vsub.f32 0.0, %v427_v8  ;;  %v444_v25 = vsub.f32 0.0, %v428_v14  ;;  %v2533_v36 = vsub.f32 %v1684_v56, %v1671_v50  ;;  %v435_v29 = vand.u32 2147483647, %v1812_v15 }
  0x58   : > { %2522 = vst [vmem:[#allocation41_spill] sm:$0xff] %v1812_v15  ;;  %v436_v37 = vand.u32 2147483647, %v1817_v16  ;;  %v445_v59 = vsub.f32 0.0, %v429_v17  ;;  %v437_v34 = vand.u32 2147483647, %v1823_v27  ;;  %v2018_v58 = vstv %s698_s28 }
  0x59   : > { %2524 = vst [vmem:[#allocation42_spill] sm:$0xff] %v1817_v16  ;;  %v1848_v41 = vmul.f32 %v409_v44, %v2533_v36  ;;  %v438_v53 = vand.u32 2147483647, %v1828_v51  ;;  %v446_v48 = vsub.f32 0.0, %v430_v19  ;;  %v439_v35 = vand.u32 2147483647, %v1833_v21 }
  0x5a   : > { %2526 = vst [vmem:[#allocation43_spill] sm:$0xff] %v1823_v27  ;;  %v440_v60 = vand.u32 2147483647, %v1839_v54  ;;  %v447_v52 = vsub.f32 0.0, %v431_v23  ;;  %v448_v32 = vsub.f32 0.0, %v432_v26  ;;  %v449_v40 = vsub.f32 0.0, %v433_v24 }
  0x5b   : > { %2528 = vst [vmem:[#allocation44_spill] sm:$0xff] %v1828_v51  ;;  %v458_v1 = vmul.f32 1.442695, %v442_v57  ;;  %v460_v50 = vmul.f32 1.442695, %v443_v42  ;;  %v450_v5 = vsub.f32 0.0, %v434_v30 }
  0x5c   : > { %2530 = vst [vmem:[#allocation45_spill] sm:$0xff] %v1833_v21  ;;  %v462_v56 = vmul.f32 1.442695, %v444_v25  ;;  %v441_v62 = vand.u32 2147483647, %v1848_v41  ;;  %v451_v3 = vsub.f32 0.0, %v435_v29 }
  0x5d   : > { %2532 = vst [vmem:[#allocation46_spill] sm:$0xff] %v1839_v54  ;;  %v464_v2 = vmul.f32 1.442695, %v445_v59  ;;  %1106 = vpow2.f32 %v458_v1  ;;  %v466_v10 = vmul.f32 1.442695, %v446_v48  ;;  %v452_v39 = vsub.f32 0.0, %v436_v37 }
  0x5e   : > { %2534 = vst [vmem:[#allocation47_spill] sm:$0xff] %v1848_v41  ;;  %v453_v11 = vsub.f32 0.0, %v437_v34  ;;  %1108 = vpow2.f32 %v460_v50  ;;  %v468_v7 = vmul.f32 1.442695, %v447_v52  ;;  %v454_v38 = vsub.f32 0.0, %v438_v53 }
  0x5f   : > { %v455_v8 = vsub.f32 0.0, %v439_v35  ;;  %1110 = vpow2.f32 %v462_v56  ;;  %v470_v14 = vmul.f32 1.442695, %v448_v32  ;;  %v456_v44 = vsub.f32 0.0, %v440_v60  ;;  %2544 = vst [vmem:[#allocation57_spill] sm:$0xff] %v2018_v58 }
  0x60   : > { %v457_v9 = vsub.f32 0.0, %v441_v62  ;;  %1112 = vpow2.f32 %v464_v2  ;;  %v472_v13 = vmul.f32 1.442695, %v449_v40  ;;  %v474_v17 = vmul.f32 1.442695, %v450_v5 }
  0x61   : > { %1114 = vpow2.f32 %v466_v10  ;;  %v476_v20 = vmul.f32 1.442695, %v451_v3  ;;  %v478_v45 = vmul.f32 1.442695, %v452_v39  ;;  %v480_v19 = vmul.f32 1.442695, %v453_v11 }
  0x62   : > { %1116 = vpow2.f32 %v468_v7  ;;  %v482_v22 = vmul.f32 1.442695, %v454_v38  ;;  %v484_v23 = vmul.f32 1.442695, %v455_v8  ;;  %v486_v24 = vmul.f32 1.442695, %v456_v44 }
  0x63   : > { %v1107_v18 = vpop.eup %1106  ;;  %1118 = vpow2.f32 %v470_v14  ;;  %v488_v30 = vmul.f32 1.442695, %v457_v9  ;;  %vm570_vm1 = vcmp.ge.f32.partialorder %v1762_v43, 0.0  ;;  %vm571_vm2 = vcmp.ge.f32.partialorder %v1767_v49, 0.0 }
  0x64   : > { %v1109_v26 = vpop.eup %1108  ;;  %1120 = vpow2.f32 %v472_v13  ;;  %vm572_vm3 = vcmp.ge.f32.partialorder %v1772_v46, 0.0  ;;  %vm573_vm4 = vcmp.ge.f32.partialorder %v1779_v4, 0.0  ;;  %vm574_vm5 = vcmp.ge.f32.partialorder %v1784_v31, 0.0 }
  0x65   : > { %v1111_v57 = vpop.eup %1110  ;;  %1122 = vpow2.f32 %v474_v17  ;;  %vm575_vm6 = vcmp.ge.f32.partialorder %v1789_v47, 0.0  ;;  %vm576_vm7 = vcmp.ge.f32.partialorder %v1794_v6, 0.0  ;;  %vm577_vm8 = vcmp.ge.f32.partialorder %v1799_v28, 0.0 }
  0x66   : > { %v1113_v42 = vpop.eup %1112  ;;  %1124 = vpow2.f32 %v476_v20  ;;  %vm578_vm9 = vcmp.ge.f32.partialorder %v1804_v12, 0.0  ;;  %vm579_vm10 = vcmp.ge.f32.partialorder %v1812_v15, 0.0  ;;  %v1867_v29 = vadd.f32 1.0, %v1107_v18 }
  0x67   : > { %v1115_v25 = vpop.eup %1114  ;;  %1126 = vpow2.f32 %v478_v45  ;;  %vm580_vm11 = vcmp.ge.f32.partialorder %v1817_v16, 0.0  ;;  %vm581_vm12 = vcmp.ge.f32.partialorder %v1823_v27, 0.0  ;;  %v1871_v59 = vadd.f32 1.0, %v1109_v26 }
  0x68   : > { %v1117_v36 = vpop.eup %1116  ;;  %1128 = vpow2.f32 %v480_v19  ;;  %vm582_vm13 = vcmp.ge.f32.partialorder %v1828_v51, 0.0  ;;  %v1876_v34 = vsel %vm570_vm1, 1.0, %v1107_v18  ;;  %v1878_v48 = vadd.f32 1.0, %v1111_v57 }
  0x69   : > { %v1119_v37 = vpop.eup %1118  ;;  %1130 = vpow2.f32 %v482_v22  ;;  %vm583_vm14 = vcmp.ge.f32.partialorder %v1833_v21, 0.0  ;;  %v1883_v35 = vsel %vm571_vm2, 1.0, %v1109_v26  ;;  %v1887_v60 = vsel %vm572_vm3, 1.0, %v1111_v57 }
  0x6a   : > { %v1121_v53 = vpop.eup %1120  ;;  %1132 = vpow2.f32 %v484_v23  ;;  %v1889_v32 = vadd.f32 1.0, %v1113_v42  ;;  %v1891_v1 = vadd.f32 1.0, %v1115_v25  ;;  %vm584_vm15 = vcmp.ge.f32.partialorder %v1839_v54, 0.0 }
  0x6b   : > { %v1123_v52 = vpop.eup %1122  ;;  %1134 = vpow2.f32 %v486_v24  ;;  %v1894_v56 = vadd.f32 1.0, %v1117_v36  ;;  %v1898_v62 = vsel %vm573_vm4, 1.0, %v1113_v42  ;;  %v1902_v40 = vsel %vm574_vm5, 1.0, %v1115_v25 }
  0x6c   : > { %v1125_v50 = vpop.eup %1124  ;;  %1136 = vpow2.f32 %v488_v30  ;;  %v1904_v5 = vadd.f32 1.0, %v1119_v37  ;;  %vm585_vm1 = vcmp.ge.f32.partialorder %v1848_v41, 0.0  ;;  %v1910_v3 = vsel %vm575_vm6, 1.0, %v1117_v36 }
  0x6d   : > { %2535 = vst [vmem:[#allocation48_spill] sm:$0xff] %v1894_v56  ;;  %v1127_v2 = vpop.eup %1126  ;;  %1138 = vrcp.f32 %v1867_v29  ;;  %v1913_v11 = vadd.f32 1.0, %v1121_v53  ;;  %v1918_v7 = vsel %vm576_vm7, 1.0, %v1119_v37  ;;  %v1921_v14 = vadd.f32 1.0, %v1123_v52 }
  0x6e   : > { %2536 = vst [vmem:[#allocation49_spill] sm:$0xff] %v1904_v5  ;;  %v1129_v39 = vpop.eup %1128  ;;  %1140 = vrcp.f32 %v1871_v59  ;;  %v1926_v44 = vsel %vm577_vm8, 1.0, %v1121_v53  ;;  %v1929_v17 = vadd.f32 1.0, %v1125_v50  ;;  %v1934_v20 = vsel %vm578_vm9, 1.0, %v1123_v52 }
  0x6f   : > { %2537 = vst [vmem:[#allocation50_spill] sm:$0xff] %v1913_v11  ;;  %v1131_v8 = vpop.eup %1130  ;;  %1142 = vrcp.f32 %v1878_v48  ;;  %v1939_v19 = vadd.f32 1.0, %v1127_v2  ;;  %v1944_v22 = vsel %vm579_vm10, 1.0, %v1125_v50  ;;  %v1949_v24 = vadd.f32 1.0, %v1129_v39 }
  0x70   : > { %2538 = vst [vmem:[#allocation51_spill] sm:$0xff] %v1921_v14  ;;  %v1133_v13 = vpop.eup %1132  ;;  %1144 = vrcp.f32 %v1889_v32  ;;  %v1954_v30 = vsel %vm580_vm11, 1.0, %v1127_v2  ;;  %v1957_v25 = vadd.f32 1.0, %v1131_v8  ;;  %v1962_v36 = vsel %vm581_vm12, 1.0, %v1129_v39 }
  0x71   : > { %2539 = vst [vmem:[#allocation52_spill] sm:$0xff] %v1929_v17  ;;  %v1135_v18 = vpop.eup %1134  ;;  %1146 = vrcp.f32 %v1891_v1  ;;  %v1965_v52 = vadd.f32 1.0, %v1133_v13  ;;  %v1970_v50 = vsel %vm582_vm13, 1.0, %v1131_v8  ;;  %v1978_v39 = vsel %vm583_vm14, 1.0, %v1133_v13 }
  0x72   : > { %2540 = vst [vmem:[#allocation53_spill] sm:$0xff] %v1939_v19  ;;  %v1137_v26 = vpop.eup %1136  ;;  %1148 = vrcp.f32 %v1894_v56  ;;  %v1973_v23 = vadd.f32 1.0, %v1135_v18  ;;  %v1985_v8 = vsel %vm584_vm15, 1.0, %v1135_v18 }
  0x73   : > { %2541 = vst [vmem:[#allocation54_spill] sm:$0xff] %v1949_v24  ;;  %v1139_v42 = vpop.eup %1138  ;;  %1150 = vrcp.f32 %v1904_v5  ;;  %v1988_v10 = vadd.f32 1.0, %v1137_v26  ;;  %v1998_v2 = vsel %vm585_vm1, 1.0, %v1137_v26 }
  0x74   : > { %v1141_v53 = vpop.eup %1140  ;;  %1152 = vrcp.f32 %v1913_v11  ;;  %v522_v9 = vmul.f32 %v1139_v42, %v1867_v29  ;;  %2542 = vst [vmem:[#allocation55_spill] sm:$0xff] %v1985_v8 }
  0x75   : > { %v1143_v57 = vpop.eup %1142  ;;  %1154 = vrcp.f32 %v1921_v14  ;;  %v523_v13 = vmul.f32 %v1141_v53, %v1871_v59  ;;  %2543 = vst [vmem:[#allocation56_spill] sm:$0xff] %v1998_v2 }
  0x76   : > { %v1145_v45 = vpop.eup %1144  ;;  %1156 = vrcp.f32 %v1929_v17  ;;  %v524_v37 = vmul.f32 %v1143_v57, %v1878_v48  ;;  %v538_v46 = vsub.f32 2.0, %v522_v9 }
  0x77   : > { %v1147_v38 = vpop.eup %1146  ;;  %1158 = vrcp.f32 %v1939_v19  ;;  %v525_v28 = vmul.f32 %v1145_v45, %v1889_v32  ;;  %v539_v61 = vsub.f32 2.0, %v523_v13 }
  0x78   : > { %v1149_v12 = vpop.eup %1148  ;;  %1160 = vrcp.f32 %v1949_v24  ;;  %v526_v18 = vmul.f32 %v1147_v38, %v1891_v1  ;;  %v540_v55 = vsub.f32 2.0, %v524_v37  ;;  %v554_v13 = vmul.f32 %v1139_v42, %v538_v46 }
  0x79   : > { %v1151_v15 = vpop.eup %1150  ;;  %1162 = vrcp.f32 %v1957_v25  ;;  %v527_v6 = vmul.f32 %v1149_v12, %v1894_v56  ;;  %v541_v47 = vsub.f32 2.0, %v525_v28 }
  0x7a   : > { %v1153_v4 = vpop.eup %1152  ;;  %1164 = vrcp.f32 %v1965_v52  ;;  %v528_v43 = vmul.f32 %v1151_v15, %v1904_v5  ;;  %v542_v27 = vsub.f32 2.0, %v526_v18  ;;  %v556_v2 = vmul.f32 %v1143_v57, %v540_v55 }
  0x7b   : > { %v1155_v26 = vpop.eup %1154  ;;  %1166 = vrcp.f32 %v1973_v23  ;;  %v529_v31 = vmul.f32 %v1153_v4, %v1913_v11  ;;  %v543_v21 = vsub.f32 2.0, %v527_v6  ;;  %v555_v11 = vmul.f32 %v1141_v53, %v539_v61 }
  0x7c   : > { %v1157_v0 = vpop.eup %1156  ;;  %1168 = vrcp.f32 %v1988_v10  ;;  %v530_v49 = vmul.f32 %v1155_v26, %v1921_v14  ;;  %v544_v18 = vsub.f32 2.0, %v528_v43  ;;  %v557_v56 = vmul.f32 %v1145_v45, %v541_v47 }
  0x7d   : > { %v1159_v9 = vpop.eup %1158  ;;  %v531_v33 = vmul.f32 %v1157_v0, %v1929_v17  ;;  %v545_v6 = vsub.f32 2.0, %v529_v31  ;;  %v558_v51 = vmul.f32 %v1147_v38, %v542_v27  ;;  %v559_v37 = vmul.f32 %v1149_v12, %v543_v21 }
  0x7e   : > { %v1161_v16 = vpop.eup %1160  ;;  %v532_v63 = vmul.f32 %v1159_v9, %v1939_v19  ;;  %v546_v46 = vsub.f32 2.0, %v530_v49  ;;  %v560_v57 = vmul.f32 %v1151_v15, %v544_v18  ;;  %v2026_v31 = vmul.f32 %v1876_v34, %v554_v13 }
  0x7f   : > { %v1163_v5 = vpop.eup %1162  ;;  %v533_v28 = vmul.f32 %v1161_v16, %v1949_v24  ;;  %v547_v42 = vsub.f32 2.0, %v531_v33  ;;  %v561_v27 = vmul.f32 %v1153_v4, %v545_v6  ;;  %v2029_v38 = vmul.f32 %v1883_v35, %v555_v11 }
  0x80   : > { %v1165_v14 = vpop.eup %1164  ;;  %v534_v17 = vmul.f32 %v1163_v5, %v1957_v25  ;;  %v548_v8 = vsub.f32 2.0, %v532_v63  ;;  %v2032_v33 = vmul.f32 %v1887_v60, %v556_v2  ;;  %v562_v12 = vmul.f32 %v1155_v26, %v546_v46  ;;  %v2557_v2 = vld [vmem:[#allocation19_spill] sm:$0xff]  ;;  %v2559_v26 = vld [vmem:[#allocation20_spill] sm:$0xff] }
  0x81   : > { %v1167_v54 = vpop.eup %1166  ;;  %v535_v19 = vmul.f32 %v1165_v14, %v1965_v52  ;;  %v549_v24 = vsub.f32 2.0, %v533_v28  ;;  %v563_v63 = vmul.f32 %v1157_v0, %v547_v42  ;;  %v2035_v21 = vmul.f32 %v1898_v62, %v557_v56  ;;  %v2545_v56 = vld [vmem:[#allocation55_spill] sm:$0xff]  ;;  %v2564_v42 = vld [vmem:[#allocation22_spill] sm:$0xff] }
  0x82   : > { %v1169_v41 = vpop.eup %1168  ;;  %v536_v58 = vmul.f32 %v1167_v54, %v1973_v23  ;;  %v550_v43 = vsub.f32 2.0, %v534_v17  ;;  %v564_v17 = vmul.f32 %v1159_v9, %v548_v8  ;;  %1170 = vlog2.f32 %v1867_v29  ;;  %v2563_v46 = vld [vmem:[#allocation51_spill] sm:$0xff] }
  0x83   : > { %v537_v55 = vmul.f32 %v1169_v41, %v1988_v10  ;;  %v551_v61 = vsub.f32 2.0, %v535_v19  ;;  %v565_v45 = vmul.f32 %v1161_v16, %v549_v24  ;;  %v2039_v4 = vmul.f32 %v1902_v40, %v558_v51  ;;  %v2546_v40 = vld [vmem:[#allocation48_spill] sm:$0xff]  ;;  %v2552_v19 = vld [vmem:[#allocation17_spill] sm:$0xff]  ;;  %v2554_v24 = vld [vmem:[#allocation18_spill] sm:$0xff] }
  0x84   : > { %v552_v47 = vsub.f32 2.0, %v536_v58  ;;  %v566_v15 = vmul.f32 %v1163_v5, %v550_v43  ;;  %1172 = vlog2.f32 %v1871_v59  ;;  %v2043_v60 = vmul.f32 %v1910_v3, %v559_v37  ;;  %v2549_v3 = vld [vmem:[#allocation57_spill] sm:$0xff] }
  0x85   : > { %v553_v49 = vsub.f32 2.0, %v537_v55  ;;  %v567_v34 = vmul.f32 %v1165_v14, %v551_v61  ;;  %v2046_v0 = vmul.f32 %v1918_v7, %v560_v57  ;;  %1174 = vlog2.f32 %v1878_v48  ;;  %v2550_v14 = vld [vmem:[#allocation56_spill] sm:$0xff]  ;;  %v2561_v37 = vld [vmem:[#allocation21_spill] sm:$0xff]  ;;  %v2566_v61 = vld [vmem:[#allocation23_spill] sm:$0xff] }
  0x86   : > { %v568_v58 = vmul.f32 %v1167_v54, %v552_v47  ;;  %v2050_v16 = vmul.f32 %v1926_v44, %v561_v27  ;;  %v2053_v29 = vmul.f32 %v1934_v20, %v562_v12  ;;  %v2056_v51 = vmul.f32 %v1944_v22, %v563_v63  ;;  %v2551_v20 = vld [vmem:[#allocation49_spill] sm:$0xff]  ;;  %v2568_v27 = vld [vmem:[#allocation24_spill] sm:$0xff] }
  0x87   : > { %v569_v35 = vmul.f32 %v1169_v41, %v553_v49  ;;  %1176 = vlog2.f32 %v1889_v32  ;;  %v2060_v54 = vmul.f32 %v1954_v30, %v564_v17  ;;  %v2063_v41 = vmul.f32 %v1962_v36, %v565_v45  ;;  %v2547_v32 = vld [vmem:[#allocation16_spill] sm:$0xff] }
  0x88   : > { %v2066_v59 = vmul.f32 %v1970_v50, %v566_v15  ;;  %1178 = vlog2.f32 %v1891_v1  ;;  %v2070_v48 = vmul.f32 %v1978_v39, %v567_v34  ;;  %v2073_v62 = vmul.f32 %v2545_v56, %v568_v58  ;;  %v1171_v7 = vpop.eup %1170  ;;  %v2556_v50 = vld [vmem:[#allocation50_spill] sm:$0xff]  ;;  %v2570_v45 = vld [vmem:[#allocation52_spill] sm:$0xff]  ;;  %v2571_v15 = vld [vmem:[#allocation25_spill] sm:$0xff] }
  0x89   : > { %1180 = vlog2.f32 %v2546_v40  ;;  %v2548_v5 = vcvt.s32.f32 %v2547_v32  ;;  %v2080_v44 = vmul.f32 %v2550_v14, %v569_v35  ;;  %v2553_v1 = vcvt.s32.f32 %v2552_v19  ;;  %v2573_v35 = vld [vmem:[#allocation26_spill] sm:$0xff]  ;;  %v2576_v19 = vld [vmem:[#allocation27_spill] sm:$0xff] }
  0x8a   : > { %1182 = vlog2.f32 %v2551_v20  ;;  %v2555_v30 = vcvt.s32.f32 %v2554_v24  ;;  %v1173_v53 = vpop.eup %1172  ;;  %v2558_v39 = vcvt.s32.f32 %v2557_v2  ;;  %v2560_v9 = vcvt.s32.f32 %v2559_v26  ;;  %v2575_v20 = vld [vmem:[#allocation53_spill] sm:$0xff]  ;;  %v2578_v2 = vld [vmem:[#allocation54_spill] sm:$0xff] }
  0x8b   : > { %v700_v11 = vmul.f32 %v2549_v3, %v2548_v5  ;;  %v701_v22 = vmul.f32 %v2549_v3, %v2553_v1  ;;  %1184 = vlog2.f32 %v2556_v50  ;;  %v2562_v28 = vcvt.s32.f32 %v2561_v37  ;;  %v1175_v6 = vpop.eup %1174 }
  0x8c   : > { %v2089_v36 = vmul.f32 %v2549_v3, %v2555_v30  ;;  %v2095_v8 = vmul.f32 %v2549_v3, %v2558_v39  ;;  %v2100_v13 = vmul.f32 %v2549_v3, %v2560_v9  ;;  %1186 = vlog2.f32 %v2563_v46  ;;  %v2579_v39 = vld [vmem:[#allocation28_spill] sm:$0xff] }
  0x8d   : > { %v2105_v18 = vmul.f32 %v2549_v3, %v2562_v28  ;;  %v2565_v43 = vcvt.s32.f32 %v2564_v42  ;;  %v2567_v57 = vcvt.s32.f32 %v2566_v61  ;;  %v2569_v49 = vcvt.s32.f32 %v2568_v27  ;;  %v1177_v63 = vpop.eup %1176  ;;  %v2581_v28 = vld [vmem:[#allocation29_spill] sm:$0xff]  ;;  %v2583_v42 = vld [vmem:[#allocation30_spill] sm:$0xff]  ;;  %v2585_v27 = vld [vmem:[#allocation32_spill] sm:$0xff] }
  0x8e   : > { %v635_v17 = vmul.f32 0.6931472, %v1171_v7  ;;  %1188 = vlog2.f32 %v2570_v45  ;;  %v2572_v34 = vcvt.s32.f32 %v2571_v15  ;;  %v2574_v56 = vcvt.s32.f32 %v2573_v35  ;;  %v1179_v32 = vpop.eup %1178  ;;  %v2587_v45 = vld [vmem:[#allocation31_spill] sm:$0xff] }
  0x8f   : > { %v2111_v55 = vmul.f32 %v2549_v3, %v2565_v43  ;;  %v2116_v47 = vmul.f32 %v2549_v3, %v2567_v57  ;;  %v2121_v12 = vmul.f32 %v2549_v3, %v2569_v49  ;;  %v637_v5 = vmul.f32 0.6931472, %v1173_v53  ;;  %v1181_v24 = vpop.eup %1180 }
  0x90   : > { %v2127_v58 = vmul.f32 %v2549_v3, %v2572_v34  ;;  %v2132_v40 = vmul.f32 %v2549_v3, %v2574_v56  ;;  %v639_v14 = vmul.f32 0.6931472, %v1175_v6  ;;  %1190 = vlog2.f32 %v2575_v20  ;;  %v1183_v53 = vpop.eup %1182 }
  0x91   : > { %v2577_v1 = vcvt.s32.f32 %v2576_v19  ;;  %v641_v30 = vmul.f32 0.6931472, %v1177_v63  ;;  %v643_v50 = vmul.f32 0.6931472, %v1179_v32  ;;  %1192 = vlog2.f32 %v2578_v2  ;;  %v1185_v57 = vpop.eup %1184  ;;  %v2589_v32 = vld [vmem:[#allocation33_spill] sm:$0xff] }
  0x92   : > { %v2580_v26 = vcvt.s32.f32 %v2579_v39  ;;  %v645_v37 = vmul.f32 0.6931472, %v1181_v24  ;;  %1194 = vlog2.f32 %v1957_v25  ;;  %v2582_v6 = vcvt.s32.f32 %v2581_v28  ;;  %v1187_v35 = vpop.eup %1186  ;;  %v2595_v28 = vld [vmem:[#allocation36_spill] sm:$0xff] }
  0x93   : > { %v2138_v7 = vmul.f32 %v2549_v3, %v2577_v1  ;;  %v2584_v43 = vcvt.s32.f32 %v2583_v42  ;;  %1196 = vlog2.f32 %v1965_v52  ;;  %v2586_v49 = vmax.f32 %v2585_v27, 0.0  ;;  %v2591_v52 = vld [vmem:[#allocation34_spill] sm:$0xff] }
  0x94   : > { %v2144_v9 = vmul.f32 %v2549_v3, %v2580_v26  ;;  %v2150_v46 = vmul.f32 %v2549_v3, %v2582_v6  ;;  %v2588_v15 = vcvt.s32.f32 %v2587_v45  ;;  %v2168_v34 = vstv %s1937_s23 }
  0x95   : > { %v2155_v61 = vmul.f32 %v2549_v3, %v2584_v43  ;;  %v2160_v63 = vadd.f32 %v635_v17, %v2586_v49  ;;  %v647_v56 = vmul.f32 0.6931472, %v1183_v53  ;;  %1198 = vlog2.f32 %v1973_v23  ;;  %v1189_v17 = vpop.eup %1188  ;;  %v2597_v43 = vld [vmem:[#allocation37_spill] sm:$0xff] }
  0x96   : > { %v2165_v25 = vmul.f32 %v2549_v3, %v2588_v15  ;;  %v2590_v20 = vmax.f32 %v2589_v32, 0.0  ;;  %v2592_v1 = vmax.f32 %v2591_v52, 0.0  ;;  %v649_v2 = vmul.f32 0.6931472, %v1185_v57  ;;  %v2593_v3 = vld [vmem:[#allocation35_spill] sm:$0xff]  ;;  %v1191_v23 = vpop.eup %1190  ;;  %v2599_v32 = vld [vmem:[#allocation38_spill] sm:$0xff] }
  0x97   : > { %1200 = vlog2.f32 %v1988_v10  ;;  %v2594_v39 = vmax.f32 %v2593_v3, 0.0  ;;  %v2596_v53 = vmax.f32 %v2595_v28, 0.0  ;;  %v651_v42 = vmul.f32 0.6931472, %v1187_v35  ;;  %v1193_v10 = vpop.eup %1192  ;;  %v2601_v3 = vld [vmem:[#allocation39_spill] sm:$0xff] }
  0x98   : > { %v2173_v19 = vadd.f32 %v637_v5, %v2590_v20  ;;  %v2177_v24 = vadd.f32 %v639_v14, %v2592_v1  ;;  %v653_v5 = vmul.f32 0.6931472, %v1189_v17  ;;  %v2598_v27 = vmax.f32 %v2597_v43, 0.0  ;;  %v1195_v15 = vpop.eup %1194  ;;  %v2603_v43 = vld [vmem:[#allocation40_spill] sm:$0xff] }
  0x99   : > { %v2182_v26 = vadd.f32 %v641_v30, %v2594_v39  ;;  %v2186_v6 = vadd.f32 %v643_v50, %v2596_v53  ;;  %v2194_v14 = vmul.f32 %v2026_v31, %v2026_v31  ;;  %v655_v57 = vmul.f32 0.6931472, %v1191_v23  ;;  %v1197_v1 = vpop.eup %1196 }
  0x9a   : > { %v2190_v49 = vadd.f32 %v645_v37, %v2598_v27  ;;  %v2198_v45 = vadd.f32 %v2168_v34, %v700_v11  ;;  %v2201_v50 = vadd.f32 %v2168_v34, %v701_v22  ;;  %v657_v35 = vmul.f32 0.6931472, %v1193_v10  ;;  %v2605_v10 = vld [vmem:[#allocation41_spill] sm:$0xff]  ;;  %v2609_v11 = vld [vmem:[#allocation43_spill] sm:$0xff] }
  0x9b   : > { %v2600_v20 = vmax.f32 %v2599_v32, 0.0  ;;  %v659_v17 = vmul.f32 0.6931472, %v1195_v15  ;;  %v2602_v39 = vmax.f32 %v2601_v3, 0.0  ;;  %v1199_v53 = vpop.eup %1198  ;;  %v661_v23 = vmul.f32 0.6931472, %v1197_v1 }
  0x9c   : > { %v2604_v27 = vmax.f32 %v2603_v43, 0.0  ;;  %v2606_v32 = vmax.f32 %v2605_v10, 0.0  ;;  %v687_v15 = vsub.f32 0.0, %v2190_v49  ;;  %v663_v3 = vmul.f32 0.6931472, %v1199_v53  ;;  %v2611_v43 = vld [vmem:[#allocation44_spill] sm:$0xff] }
  0x9d   : > { %v2205_v37 = vadd.f32 %v647_v56, %v2600_v20  ;;  %v2211_v28 = vadd.f32 %v649_v2, %v2602_v39  ;;  %v1201_v52 = vpop.eup %1200  ;;  %v2607_v2 = vld [vmem:[#allocation42_spill] sm:$0xff]  ;;  %v2610_v22 = vmax.f32 %v2609_v11, 0.0  ;;  %v720_v53 = vadd.f32 %v2168_v34, %v2095_v8 }
  0x9e   : > { %v2217_v56 = vadd.f32 %v651_v42, %v2604_v27  ;;  %v2221_v20 = vadd.f32 %v653_v5, %v2606_v32  ;;  %v2608_v39 = vmax.f32 %v2607_v2, 0.0  ;;  %v719_v42 = vadd.f32 %v2168_v34, %v2089_v36  ;;  %v2613_v32 = vld [vmem:[#allocation45_spill] sm:$0xff]  ;;  %v2615_v11 = vld [vmem:[#allocation46_spill] sm:$0xff] }
  0x9f   : > { %v2230_v30 = vadd.f32 %v657_v35, %v2610_v22  ;;  %v665_v1 = vmul.f32 0.6931472, %v1201_v52  ;;  %v2612_v27 = vmax.f32 %v2611_v43, 0.0  ;;  %v688_v10 = vsub.f32 0.0, %v2205_v37 }
  0xa0   : > { %v2226_v31 = vadd.f32 %v655_v57, %v2608_v39  ;;  %v2614_v57 = vmax.f32 %v2613_v32, 0.0  ;;  %v2616_v35 = vmax.f32 %v2615_v11, 0.0  ;;  %v721_v52 = vadd.f32 %v2168_v34, %v2100_v13  ;;  %v2617_v32 = vld [vmem:[#allocation47_spill] sm:$0xff] }
  0xa1   : > { %v2236_v5 = vadd.f32 %v659_v17, %v2612_v27  ;;  %v722_v8 = vadd.f32 %v2168_v34, %v2105_v18  ;;  %v724_v27 = vadd.f32 %v2168_v34, %v2116_v47  ;;  %v725_v13 = vadd.f32 %v2168_v34, %v2121_v12 }
  0xa2   : > { %v2243_v2 = vadd.f32 %v661_v23, %v2614_v57  ;;  %v2247_v22 = vadd.f32 %v663_v3, %v2616_v35  ;;  %v723_v23 = vadd.f32 %v2168_v34, %v2111_v55  ;;  %v2618_v57 = vmax.f32 %v2617_v32, 0.0 }
  0xa3   : > { %v726_v18 = vadd.f32 %v2168_v34, %v2127_v58  ;;  %v727_v55 = vadd.f32 %v2168_v34, %v2132_v40  ;;  %v728_v47 = vadd.f32 %v2168_v34, %v2138_v7  ;;  %v729_v12 = vadd.f32 %v2168_v34, %v2144_v9 }
  0xa4   : > { %v2266_v11 = vadd.f32 %v665_v1, %v2618_v57  ;;  %v730_v1 = vadd.f32 %v2168_v34, %v2150_v46  ;;  %v731_v32 = vadd.f32 %v2168_v34, %v2155_v61  ;;  %v2285_v58 = vadd.f32 %v2168_v34, %v2165_v25 }
  0xa5   : > { %v733_v40 = vsub.f32 0.0, %v2198_v45  ;;  %v734_v57 = vsub.f32 0.0, %v2201_v50  ;;  %v735_v43 = vsub.f32 0.0, %v719_v42  ;;  %v736_v3 = vsub.f32 0.0, %v720_v53 }
  0xa6   : > { %v737_v7 = vsub.f32 0.0, %v721_v52  ;;  %v738_v35 = vsub.f32 0.0, %v722_v8  ;;  %v739_v39 = vsub.f32 0.0, %v723_v23  ;;  %v740_v9 = vsub.f32 0.0, %v724_v27 }
  0xa7   : > { %v751_v46 = vmul.f32 %v2032_v33, %v2032_v33  ;;  %v741_v17 = vsub.f32 0.0, %v725_v13  ;;  %v742_v36 = vsub.f32 0.0, %v726_v18  ;;  %v743_v61 = vsub.f32 0.0, %v727_v55 }
  0xa8   : > { %v753_v25 = vmul.f32 %v2039_v4, %v2039_v4  ;;  %v750_v34 = vmul.f32 %v2029_v38, %v2029_v38  ;;  %v752_v45 = vmul.f32 %v2035_v21, %v2035_v21  ;;  %v754_v50 = vmul.f32 %v2043_v60, %v2043_v60 }
  0xa9   : > { %v755_v42 = vmul.f32 %v2046_v0, %v2046_v0  ;;  %v744_v53 = vsub.f32 0.0, %v728_v47  ;;  %v745_v33 = vsub.f32 0.0, %v729_v12  ;;  %v746_v52 = vsub.f32 0.0, %v730_v1 }
  0xaa   : > { %v756_v8 = vmul.f32 %v2050_v16, %v2050_v16  ;;  %v747_v23 = vsub.f32 0.0, %v731_v32  ;;  %v757_v4 = vmul.f32 %v2053_v29, %v2053_v29  ;;  %v765_v38 = vmul.f32 %v2194_v14, %v733_v40 }
  0xab   : > { %v767_v27 = vmul.f32 %v751_v46, %v735_v43  ;;  %v748_v21 = vsub.f32 0.0, %v2285_v58  ;;  %v758_v60 = vmul.f32 %v2056_v51, %v2056_v51  ;;  %v759_v0 = vmul.f32 %v2060_v54, %v2060_v54 }
  0xac   : > { %v769_v13 = vmul.f32 %v753_v25, %v737_v7  ;;  %v766_v18 = vmul.f32 %v750_v34, %v734_v57  ;;  %v768_v55 = vmul.f32 %v752_v45, %v736_v3  ;;  %v770_v47 = vmul.f32 %v754_v50, %v738_v35 }
  0xad   : > { %v771_v16 = vmul.f32 %v755_v42, %v739_v39  ;;  %v760_v12 = vmul.f32 %v2063_v41, %v2063_v41  ;;  %v761_v29 = vmul.f32 %v2066_v59, %v2066_v59  ;;  %v762_v14 = vmul.f32 %v2070_v48, %v2070_v48 }
  0xae   : > { %v772_v43 = vmul.f32 %v756_v8, %v740_v9  ;;  %v763_v51 = vmul.f32 %v2073_v62, %v2073_v62  ;;  %v773_v1 = vmul.f32 %v757_v4, %v741_v17  ;;  %v2619_v54 = vsub.f32 0.0, %v2160_v63 }
  0xaf   : > { %v2620_v3 = vsub.f32 0.0, %v2177_v24  ;;  %v764_v41 = vmul.f32 %v2080_v44, %v2080_v44  ;;  %v774_v35 = vmul.f32 %v758_v60, %v742_v36  ;;  %v775_v58 = vmul.f32 %v759_v0, %v743_v61 }
  0xb0   : > { %v781_v32 = vmul.f32 %v765_v38, %v2619_v54  ;;  %v2621_v59 = vsub.f32 0.0, %v2186_v6  ;;  %v2622_v48 = vsub.f32 0.0, %v2173_v19  ;;  %v2623_v62 = vsub.f32 0.0, %v2182_v26  ;;  %v797_v54 = vld [vmem:[%s1531_s22] sm:$0xff] }
  0xb1   : > { %v783_v39 = vmul.f32 %v767_v27, %v2620_v3  ;;  %v786_v63 = vmul.f32 %v770_v47, %v687_v15  ;;  %v787_v24 = vmul.f32 %v771_v16, %v688_v10  ;;  %v776_v7 = vmul.f32 %v760_v12, %v744_v53 }
  0xb2   : > { %v785_v40 = vmul.f32 %v769_v13, %v2621_v59  ;;  %v782_v57 = vmul.f32 %v766_v18, %v2622_v48  ;;  %v784_v17 = vmul.f32 %v768_v55, %v2623_v62  ;;  %v777_v9 = vmul.f32 %v761_v29, %v745_v33 }
  0xb3   : > { %v778_v44 = vmul.f32 %v762_v14, %v746_v52  ;;  %v2624_v36 = vsub.f32 0.0, %v2211_v28  ;;  %v2625_v6 = vsub.f32 0.0, %v2217_v56  ;;  %v800_v19 = vsel %vm292_vm0, %v781_v32, 0.0 }
  0xb4   : > { %v801_v26 = vsel %vm292_vm0, %v783_v39, 0.0  ;;  %v803_v25 = vsel %vm292_vm0, %v785_v40, 0.0  ;;  %v779_v49 = vmul.f32 %v763_v51, %v747_v23  ;;  %v2626_v15 = vsub.f32 0.0, %v2221_v20 }
  0xb5   : > { %v788_v46 = vmul.f32 %v772_v43, %v2624_v36  ;;  %v789_v61 = vmul.f32 %v773_v1, %v2625_v6  ;;  %v2627_v10 = vsub.f32 0.0, %v2226_v31  ;;  %v802_v45 = vadd.f32 %v801_v26, %v800_v19 }
  0xb6   : > { %v790_v37 = vmul.f32 %v774_v35, %v2626_v15  ;;  %v805_v28 = vsel %vm292_vm0, %v787_v24, 0.0  ;;  %v815_v50 = vsel %vm292_vm0, %v782_v57, 0.0  ;;  %v816_v56 = vsel %vm292_vm0, %v784_v17, 0.0 }
  0xb7   : > { %v791_v34 = vmul.f32 %v775_v58, %v2627_v10  ;;  %v818_v42 = vsel %vm292_vm0, %v786_v63, 0.0  ;;  %v697_v53 = vsub.f32 0.0, %v2266_v11  ;;  %v780_v33 = vmul.f32 %v764_v41, %v748_v21  ;;  %v798_v41 = vld [vmem:[%s1531_s22 + $0x8] sm:$0xff] }
  0xb8   : > { %v804_v52 = vadd.f32 %v803_v25, %v802_v45  ;;  %v817_v8 = vadd.f32 %v816_v56, %v815_v50  ;;  %v2628_v20 = vsub.f32 0.0, %v2230_v30  ;;  %v2629_v31 = vsub.f32 0.0, %v2236_v5 }
  0xb9   : > { %v807_v38 = vsel %vm292_vm0, %v789_v61, 0.0  ;;  %v820_v27 = vsel %vm292_vm0, %v788_v46, 0.0  ;;  %v2630_v13 = vsub.f32 0.0, %v2243_v2  ;;  %v2631_v11 = vsub.f32 0.0, %v2247_v22 }
  0xba   : > { %v792_v23 = vmul.f32 %v776_v7, %v2628_v20  ;;  %v793_v4 = vmul.f32 %v777_v9, %v2629_v31  ;;  %v806_v60 = vadd.f32 %v805_v28, %v804_v52  ;;  %v819_v0 = vadd.f32 %v818_v42, %v817_v8 }
  0xbb   : > { %v794_v18 = vmul.f32 %v778_v44, %v2630_v13  ;;  %v795_v21 = vmul.f32 %v779_v49, %v2631_v11  ;;  %v809_v55 = vsel %vm292_vm0, %v791_v34, 0.0  ;;  %v822_v30 = vsel %vm292_vm0, %v790_v37, 0.0 }
  0xbc   : > { %v808_v47 = vadd.f32 %v807_v38, %v806_v60  ;;  %v821_v5 = vadd.f32 %v820_v27, %v819_v0  ;;  %v796_v16 = vmul.f32 %v780_v33, %v697_v53  ;;  %v811_v12 = vsel %vm292_vm0, %v793_v4, 0.0 }
  0xbd   : > { %v824_v29 = vsel %vm292_vm0, %v792_v23, 0.0  ;;  %v813_v22 = vsel %vm292_vm0, %v795_v21, 0.0  ;;  %v826_v43 = vsel %vm292_vm0, %v794_v18, 0.0 }
  0xbe   : > { %v810_v2 = vadd.f32 %v809_v55, %v808_v47  ;;  %v823_v14 = vadd.f32 %v822_v30, %v821_v5  ;;  %v828_v32 = vsel %vm292_vm0, %v796_v16, 0.0 }
  0xc0   : > { %v812_v51 = vadd.f32 %v811_v12, %v810_v2  ;;  %v825_v1 = vadd.f32 %v824_v29, %v823_v14 }
  0xc2   : > { %v814_v3 = vadd.f32 %v813_v22, %v812_v51  ;;  %v827_v39 = vadd.f32 %v826_v43, %v825_v1 }
  0xc4   : > { %v829_v35 = vadd.f32 %v828_v32, %v827_v39  ;;  %v830_v58 = vadd.f32 %v814_v3, %v797_v54 }
  0xc6   : > { %v831_v59 = vadd.f32 %v829_v35, %v798_v41  ;;  %832 = vst.msk [vmem:[%s1531_s22] sm:$0xff] %vm292_vm0, %v830_v58 }
  0xc8   : > { %833 = vst.msk [vmem:[%s1531_s22 + $0x8] sm:$0xff] %vm292_vm0, %v831_v59 }
  0xc9   : > { %1304 = shalt.err (!%p1301_p1)
}
  0xca   : > { %s1373_s17 = smov 128   ;;  %s1374_s29 = smov 8  }
  0xcb   : > { %1031 = dma.vmem_to_hbm [thread:$0]  (%p1447_p8), %s850_s15, 256, %s852_s9, %s835_s11, %s1373_s17, %s1373_s17, %s1374_s29  }
  0xcc PF: > { %s2632_s30 = sld [smem:[#allocation14_spill]]  ;;  %s866_s22 = sand.u32 1, %s1347_s12  }
  0xcd   : > { %p1045_p2 = pnand %p986_p13, %p1451_p9  ;;  %s867_s23 = scalar_lea.sflag [#allocation4], %s866_s22 }
  0xcf   : > { %p1046_p4 = pneg %p1045_p2 }
  0xd1   : > { %1342 = dma.done.wait (%p1046_p4), %s867_s23, 256  }
  0xd2   : > { %1344 = vsyncadd (%p1046_p4), %s867_s23, 4294967040  ;;  %s23_s17 = sadd.s32 1, %s2632_s30   ;;  %s2633_s24 = sld [smem:[#allocation15_spill]] }
  0xd3   : > { %p20_p6 = scmp.ge.s32.totalorder %s23_s17, 4   ;;  %s2634_s12 = smov %s1351_s13 }
  0xd4   : > { %s2635_s13 = smov %s1355_s14  ;;  %s2636_s14 = smov %s1492_s26 }
  0xd5   : > { %s2637_s15 = smov %s1363_s16  ;;  %22 = sbr.rel (!%p20_p6) target bundleno = 11 (0xb), region = 100 }
  0xd8   : > { %s2638_s16 = smov %s2633_s24 }
  0xda   :  { %873 = vsyncpa [#allocation3], 1 }
  0xdb   :  { %875 = vsyncpa [#allocation3 + $0x1], 1 }
  0xdc   :  { %876 = vsyncpa [#allocation8], 1 }
  0xdd   :  { %878 = vsyncpa [#allocation8 + $0x1], 1 }
  0xde   :  { %879 = vsyncpa [#allocation4], 1 }
  0xdf   :  { %881 = vsyncpa [#allocation4 + $0x1], 1 }
  0xe0   :  { %882 = vsyncpa [#allocation5], 1 }
  0xe1   :  { %884 = vsyncpa [#allocation5 + $0x1], 1 }

</bundles_post_ra>
